<compile_context>
chip_gen: v7x
topology: tpu7x:2x2x1
jax: 0.10.0
libtpu: 0.0.40
codegen_flags: <defaults>
</compile_context>

<pallas_src>
import jax
import jax.numpy as jnp
from jax.experimental import pallas as pl
from jax.experimental.pallas import tpu as pltpu

LANE = 128
SUBLANE = 8


def _round_up(x, m):
    return ((x + m - 1) // m) * m


def _vmem_limit_bytes():
    """Per-generation VMEM budget (v7x: 64 MiB physical; v5e/v6e: 128 MiB)."""
    cap = 128 << 20
    try:
        cap = int(pltpu.get_tpu_info().vmem_capacity_bytes)
    except Exception:
        pass
    return int(min(cap * 3 // 4, 96 << 20))


def fold_bn(gamma, beta, running_mean, running_var, eps=1e-5):
    scale = gamma / jnp.sqrt(running_var + eps)
    shift = beta - running_mean * scale
    return scale, shift


def prepare_linear(w, b, bn=None, *, target_tk=2048, target_tn=1024,
                   full_k_limit=6144, weight_dtype=jnp.bfloat16):
    """One-time weight prep: transpose (out,in)->(K,N), cast to bf16, pad, pick tiles."""
    n_out, k_in = w.shape

    npad0 = _round_up(n_out, LANE)
    tn = min(target_tn, npad0)                 # tn is a multiple of 128
    npad = _round_up(npad0, tn)

    kpad0 = _round_up(k_in, LANE)
    if kpad0 <= full_k_limit:                  # full-K slab: drop the K grid axis
        tk, kpad = kpad0, kpad0
    else:                                      # split K (e.g. lin0 with in_dim=15724)
        tk = min(target_tk, kpad0)
        kpad = _round_up(kpad0, tk)

    w_kn = jnp.pad(w.T.astype(weight_dtype),
                   ((0, kpad - k_in), (0, npad - n_out)))
    b_p = jnp.pad(b.astype(jnp.float32), (0, npad - n_out)).reshape(1, npad)

    scale_p = shift_p = None
    if bn is not None:
        s, t = fold_bn(*bn)
        scale_p = jnp.pad(s.astype(jnp.float32), (0, npad - n_out)).reshape(1, npad)
        shift_p = jnp.pad(t.astype(jnp.float32), (0, npad - n_out)).reshape(1, npad)

    return dict(w=w_kn, b=b_p, scale=scale_p, shift=shift_p,
                tk=tk, tn=tn, n_out=n_out)


def fused_linear(x, layer, residual=None):
    """y = [relu(x@W + b)*scale + shift [+ residual]] or plain x@W + b, tiled on TPU."""
    w, b = layer["w"], layer["b"]
    scale, shift = layer["scale"], layer["shift"]
    tk, tn, n_out = layer["tk"], layer["tn"], layer["n_out"]
    kpad, npad = w.shape
    w_dtype = w.dtype

    m = x.shape[0]
    mpad = _round_up(max(m, SUBLANE), SUBLANE)

    # Activations are tiny (batch rows); padding them per call is negligible HBM traffic.
    xp = jnp.pad(x, ((0, mpad - m), (0, kpad - x.shape[1])))
    apply_bn = scale is not None
    apply_res = residual is not None
    if apply_res:
        rp = jnp.pad(residual, ((0, mpad - m), (0, npad - residual.shape[1])))

    n_k = kpad // tk
    n_n = npad // tn
    split_k = n_k > 1

    def kernel(*refs):
        i = 0
        x_ref = refs[i]; i += 1
        w_ref = refs[i]; i += 1
        b_ref = refs[i]; i += 1
        if apply_bn:
            s_ref = refs[i]; i += 1
            t_ref = refs[i]; i += 1
        if apply_res:
            r_ref = refs[i]; i += 1
        o_ref = refs[i]

        def finalize(acc):
            y = acc + b_ref[...]
            if apply_bn:
                y = jnp.maximum(y, 0.0)                    # ReLU
                y = y * s_ref[...] + t_ref[...]            # folded BatchNorm1d (eval)
            if apply_res:
                y = y + r_ref[...]                         # residual add
            return y.astype(o_ref.dtype)

        part = jnp.dot(x_ref[...].astype(w_dtype), w_ref[...],
                       preferred_element_type=jnp.float32)

        if split_k:
            k = pl.program_id(1)

            @pl.when(k == 0)
            def _():
                o_ref[...] = jnp.zeros_like(o_ref)

            o_ref[...] += part                             # accumulate in resident f32 out block

            @pl.when(k == pl.num_programs(1) - 1)
            def _():
                o_ref[...] = finalize(o_ref[...])
        else:
            o_ref[...] = finalize(part)

    if split_k:
        grid = (n_n, n_k)
        x_map = lambda j, k: (0, k)
        w_map = lambda j, k: (k, j)
        v_map = lambda j, k: (0, j)
        o_map = lambda j, k: (0, j)
        sem = ("parallel", "arbitrary")
    else:
        grid = (n_n,)
        x_map = lambda j: (0, 0)
        w_map = lambda j: (0, j)
        v_map = lambda j: (0, j)
        o_map = lambda j: (0, j)
        sem = ("parallel",)

    in_specs = [
        pl.BlockSpec((mpad, tk), x_map),
        pl.BlockSpec((tk, tn), w_map),
        pl.BlockSpec((1, tn), v_map),
    ]
    inputs = [xp, w, b]
    if apply_bn:
        in_specs += [pl.BlockSpec((1, tn), v_map), pl.BlockSpec((1, tn), v_map)]
        inputs += [scale, shift]
    if apply_res:
        in_specs.append(pl.BlockSpec((mpad, tn), o_map))
        inputs.append(rp)

    out = pl.pallas_call(
        kernel,
        out_shape=jax.ShapeDtypeStruct((mpad, npad), jnp.float32),
        grid_spec=pltpu.PrefetchScalarGridSpec(
            num_scalar_prefetch=0,
            grid=grid,
            in_specs=in_specs,
            out_specs=pl.BlockSpec((mpad, tn), o_map),
        ),
        compiler_params=pltpu.CompilerParams(
            dimension_semantics=sem,
            vmem_limit_bytes=_vmem_limit_bytes()),
    )(*inputs)

    return out[:m, :n_out]


def prepare_brain_network(params, **tile_kwargs):
    """One-time parameter preparation (transpose, bf16 cast, pad, BN fold, tile choice)."""
    prep = {}
    w0, b0 = params["lin0"]
    prep["lin0"] = prepare_linear(w0, b0, bn=params["bn0"], **tile_kwargs)
    prep["mlp"] = [prepare_linear(wi, bi, bn=bn_i, **tile_kwargs)
                   for (wi, bi), bn_i in params["mlp"]]
    w1, b1 = params["lin1"]
    prep["lin1"] = prepare_linear(w1, b1, bn=None, **tile_kwargs)
    return prep


def brain_network_forward(x, prep):
    """Pallas implementation of BrainNetwork.forward (eval mode)."""
    x = fused_linear(x, prep["lin0"])
    residual = x
    for layer in prep["mlp"]:
        x = fused_linear(x, layer, residual=residual)
        residual = x
    # x = x.reshape(len(x), -1) is a no-op for 2-D (bs, h) activations.
    return fused_linear(x, prep["lin1"])


def brain_network_ref(x, prep):
    """Pure-JAX reference using the same prepared (bf16, padded) parameters."""
    def lin(x, layer, residual=None):
        kpad, npad = layer["w"].shape
        xp = jnp.pad(x, ((0, 0), (0, kpad - x.shape[1])))
        y = jnp.dot(xp.astype(layer["w"].dtype), layer["w"],
                    preferred_element_type=jnp.float32) + layer["b"]
        if layer["scale"] is not None:
            y = jnp.maximum(y, 0.0) * layer["scale"] + layer["shift"]
        if residual is not None:
            y = y + jnp.pad(residual, ((0, 0), (0, npad - residual.shape[1])))
        return y[:, :layer["n_out"]]

    x = lin(x, prep["lin0"])
    residual = x
    for layer in prep["mlp"]:
        x = lin(x, layer, residual=residual)
        residual = x
    return lin(x, prep["lin1"])


def init_params(key, in_dim, h, out_dim):
    """Deterministic synthetic parameters matching BrainNetwork's shapes (torch layout)."""
    def linear(k, fan_in, fan_out):
        kw, kb = jax.random.split(k)
        w = jax.random.normal(kw, (fan_out, fan_in), jnp.float32) * (1.0 / jnp.sqrt(fan_in))
        b = jax.random.normal(kb, (fan_out,), jnp.float32) * 0.01
        return w, b

    def bn(k, n):
        kg, kb, km, kv = jax.random.split(k, 4)
        gamma = 1.0 + 0.1 * jax.random.normal(kg, (n,), jnp.float32)
        beta = 0.1 * jax.random.normal(kb, (n,), jnp.float32)
        rmean = 0.1 * jax.random.normal(km, (n,), jnp.float32)
        rvar = jnp.abs(1.0 + 0.1 * jax.random.normal(kv, (n,), jnp.float32))
        return gamma, beta, rmean, rvar

    keys = jax.random.split(key, 12)
    params = {}
    params["lin0"] = linear(keys[0], in_dim, h)
    params["bn0"] = bn(keys[1], h)
    params["mlp"] = []
    for i in range(4):
        params["mlp"].append((linear(keys[2 + 2 * i], h, h), bn(keys[3 + 2 * i], h)))
    params["lin1"] = linear(keys[10], h, out_dim)
    return params


if __name__ == "__main__":
    # Small shapes consistent with the module (real: in_dim=15724, h=4096, out_dim=768).
    # IN_DIM/OUT_DIM/BS are deliberately NOT 128/8-aligned to exercise the padding path.
    BS, IN_DIM, H, OUT_DIM = 6, 500, 256, 96

    key = jax.random.PRNGKey(0)
    kx, kp = jax.random.split(key)
    x = jax.random.normal(kx, (BS, IN_DIM), jnp.float32)
    params = init_params(kp, IN_DIM, H, OUT_DIM)

    # Small tile targets so both kernel variants run at toy size:
    # lin0 (K=500 -> padded 512 > 256) takes the split-K accumulate path,
    # the H x H layers take the single-K-slab path. Production defaults are
    # target_tk=2048, target_tn=1024, full_k_limit=6144.
    prep = prepare_brain_network(params, target_tk=256, target_tn=128, full_k_limit=256)

    out = jax.block_until_ready(brain_network_forward(x, prep))
    ref = jax.block_until_ready(brain_network_ref(x, prep))

    assert out.shape == (BS, OUT_DIM), out.shape
    assert jnp.allclose(out, ref, atol=1e-3, rtol=1e-3), float(jnp.max(jnp.abs(out - ref)))
    print("KERNEL_OK")
</pallas_src>

<mosaic_0001>
module attributes {stable_mosaic.version = 11 : i64} {
  func.func @kernel(%arg0: i32, %arg1: i32, %arg2: memref<8x256xf32, #tpu.memory_space<vmem>>, %arg3: memref<256x128xbf16, #tpu.memory_space<vmem>>, %arg4: memref<1x128xf32, #tpu.memory_space<vmem>>, %arg5: memref<1x128xf32, #tpu.memory_space<vmem>>, %arg6: memref<1x128xf32, #tpu.memory_space<vmem>>, %arg7: memref<8x128xf32, #tpu.memory_space<vmem>>) attributes {dimension_semantics = [#tpu.dimension_semantics<parallel>, #tpu.dimension_semantics<arbitrary>], iteration_bounds = array<i64: 2, 2>, scalar_prefetch = 0 : i64, scratch_operands = 0 : i64, tpu.core_type = #tpu.core_type<tc>, window_params = [{transform_indices = @transform_0, window_bounds = array<i64: 8, 256>}, {transform_indices = @transform_1, window_bounds = array<i64: 256, 128>}, {transform_indices = @transform_2, window_bounds = array<i64: 1, 128>}, {transform_indices = @transform_3, window_bounds = array<i64: 1, 128>}, {transform_indices = @transform_4, window_bounds = array<i64: 1, 128>}, {transform_indices = @transform_5, window_bounds = array<i64: 8, 128>}]} {
    %c0 = arith.constant 0 : index
    %c0_0 = arith.constant 0 : index
    %0 = vector.load %arg2[%c0, %c0_0] : memref<8x256xf32, #tpu.memory_space<vmem>>, vector<8x256xf32>
    %1 = arith.truncf %0 : vector<8x256xf32> to vector<8x256xbf16>
    %c0_1 = arith.constant 0 : index
    %c0_2 = arith.constant 0 : index
    %2 = vector.load %arg3[%c0_1, %c0_2] : memref<256x128xbf16, #tpu.memory_space<vmem>>, vector<256x128xbf16>
    %cst = arith.constant dense<0.000000e+00> : vector<8x128xf32>
    %3 = tpu.matmul %1, %2, %cst {dimension_numbers = #tpu.dot_dimension_numbers<[1], [0], [0], [1], [0, 0, 1, 1], [], []>} : vector<8x256xbf16>, vector<256x128xbf16>, vector<8x128xf32> -> vector<8x128xf32>
    %c0_i32 = arith.constant 0 : i32
    %4 = arith.cmpi eq, %arg1, %c0_i32 : i32
    %5 = arith.extui %4 : i1 to i32
    %c0_i32_3 = arith.constant 0 : i32
    %6 = arith.cmpi ne, %5, %c0_i32_3 : i32
    scf.if %6 {
      %cst_9 = arith.constant 0.000000e+00 : f32
      %13 = vector.broadcast %cst_9 : f32 to vector<8x128xf32>
      %c0_10 = arith.constant 0 : index
      %c0_11 = arith.constant 0 : index
      %14 = vector.load %arg7[%c0_10, %c0_11] : memref<8x128xf32, #tpu.memory_space<vmem>>, vector<8x128xf32>
      tpu.vector_store %arg7[%c0_10, %c0_11], %13 {strides = array<i32>} : memref<8x128xf32, #tpu.memory_space<vmem>>, vector<8x128xf32>,
    } else {
    }
    %c0_4 = arith.constant 0 : index
    %c0_5 = arith.constant 0 : index
    %7 = vector.load %arg7[%c0_4, %c0_5] : memref<8x128xf32, #tpu.memory_space<vmem>>, vector<8x128xf32>
    %8 = arith.addf %7, %3 : vector<8x128xf32>
    %c0_6 = arith.constant 0 : index
    %c0_7 = arith.constant 0 : index
    %9 = vector.load %arg7[%c0_6, %c0_7] : memref<8x128xf32, #tpu.memory_space<vmem>>, vector<8x128xf32>
    tpu.vector_store %arg7[%c0_6, %c0_7], %8 {strides = array<i32>} : memref<8x128xf32, #tpu.memory_space<vmem>>, vector<8x128xf32>,
    %c1_i32 = arith.constant 1 : i32
    %10 = arith.cmpi eq, %arg1, %c1_i32 : i32
    %11 = arith.extui %10 : i1 to i32
    %c0_i32_8 = arith.constant 0 : i32
    %12 = arith.cmpi ne, %11, %c0_i32_8 : i32
    scf.if %12 {
      %c0_9 = arith.constant 0 : index
      %c0_10 = arith.constant 0 : index
      %13 = vector.load %arg7[%c0_9, %c0_10] : memref<8x128xf32, #tpu.memory_space<vmem>>, vector<8x128xf32>
      %c0_11 = arith.constant 0 : index
      %c0_12 = arith.constant 0 : index
      %14 = vector.load %arg4[%c0_11, %c0_12] : memref<1x128xf32, #tpu.memory_space<vmem>>, vector<1x128xf32>
      %15 = vector.broadcast %14 : vector<1x128xf32> to vector<8x128xf32>
      %16 = arith.addf %13, %15 : vector<8x128xf32>
      %cst_13 = arith.constant 0.000000e+00 : f32
      %17 = vector.broadcast %cst_13 : f32 to vector<8x128xf32>
      %18 = arith.maximumf %16, %17 : vector<8x128xf32>
      %c0_14 = arith.constant 0 : index
      %c0_15 = arith.constant 0 : index
      %19 = vector.load %arg5[%c0_14, %c0_15] : memref<1x128xf32, #tpu.memory_space<vmem>>, vector<1x128xf32>
      %20 = vector.broadcast %19 : vector<1x128xf32> to vector<8x128xf32>
      %21 = arith.mulf %18, %20 : vector<8x128xf32>
      %c0_16 = arith.constant 0 : index
      %c0_17 = arith.constant 0 : index
      %22 = vector.load %arg6[%c0_16, %c0_17] : memref<1x128xf32, #tpu.memory_space<vmem>>, vector<1x128xf32>
      %23 = vector.broadcast %22 : vector<1x128xf32> to vector<8x128xf32>
      %24 = arith.addf %21, %23 : vector<8x128xf32>
      %c0_18 = arith.constant 0 : index
      %c0_19 = arith.constant 0 : index
      %25 = vector.load %arg7[%c0_18, %c0_19] : memref<8x128xf32, #tpu.memory_space<vmem>>, vector<8x128xf32>
      tpu.vector_store %arg7[%c0_18, %c0_19], %24 {strides = array<i32>} : memref<8x128xf32, #tpu.memory_space<vmem>>, vector<8x128xf32>,
    } else {
    }
    return
  }
  func.func @transform_0(%arg0: i32, %arg1: i32) -> (i32, i32) {
    %c0_i32 = arith.constant 0 : i32
    %c0_i32_0 = arith.constant 0 : i32
    return %c0_i32, %arg1 : i32, i32
  }
  func.func @transform_1(%arg0: i32, %arg1: i32) -> (i32, i32) {
    %c0_i32 = arith.constant 0 : i32
    return %arg1, %arg0 : i32, i32
  }
  func.func @transform_2(%arg0: i32, %arg1: i32) -> (i32, i32) {
    %c0_i32 = arith.constant 0 : i32
    %c0_i32_0 = arith.constant 0 : i32
    return %c0_i32, %arg0 : i32, i32
  }
  func.func @transform_3(%arg0: i32, %arg1: i32) -> (i32, i32) {
    %c0_i32 = arith.constant 0 : i32
    %c0_i32_0 = arith.constant 0 : i32
    return %c0_i32, %arg0 : i32, i32
  }
  func.func @transform_4(%arg0: i32, %arg1: i32) -> (i32, i32) {
    %c0_i32 = arith.constant 0 : i32
    %c0_i32_0 = arith.constant 0 : i32
    return %c0_i32, %arg0 : i32, i32
  }
  func.func @transform_5(%arg0: i32, %arg1: i32) -> (i32, i32) {
    %c0_i32 = arith.constant 0 : i32
    %c0_i32_0 = arith.constant 0 : i32
    return %c0_i32, %arg0 : i32, i32
  }
}

</mosaic_0001>

<bundles_post_ra>
// kernel: tpu_custom_call.1
= control target key start
LH: loop header
LB: loop body
LE: loop exit
PB: predicated region body
PF: predicated region fallthrough
CT: control target
= control target key end

     0   :  { %s1874_s0 = inlined_call_operand.hbm [shape: f32[8,512], index: 0, kind: input, shape index: {}]   ;;  %s1875_s1 = inlined_call_operand.hbm [shape: bf16[512,256], index: 1, kind: input, shape index: {}]   ;;  %s1876_s2 = inlined_call_operand.hbm [shape: f32[1,256], index: 2, kind: input, shape index: {}]   ;;  %s1877_s3 = inlined_call_operand.hbm [shape: f32[1,256], index: 3, kind: input, shape index: {}]   ;;  %s1878_s4 = inlined_call_operand.hbm [shape: f32[1,256], index: 4, kind: input, shape index: {}]   ;;  %s1879_s5 = inlined_call_operand.hbm [shape: f32[8,256], index: 5, kind: output, shape index: {}]  }
   0x1   :  { %1909 = sst [smem:[#allocation33_spill]] %s1875_s1 }
   0x2   :  { %1910 = sst [smem:[#allocation34_spill]] %s1877_s3 }
   0x3   :  { %1911 = sst [smem:[#allocation35_spill]] %s1879_s5 }
   0x4   :  { %10 = vsyncpa [#allocation3], 0 }
   0x5   :  { %12 = vsyncpa [#allocation3 + $0x1], 0 }
   0x6   :  { %13 = vsyncpa [#allocation6], 0 }
   0x7   :  { %15 = vsyncpa [#allocation6 + $0x1], 0 }
   0x8   :  { %16 = vsyncpa [#allocation9], 0 }
   0x9   :  { %18 = vsyncpa [#allocation9 + $0x1], 0 }
   0xa   :  { %19 = vsyncpa [#allocation4], 0 }
   0xb   :  { %21 = vsyncpa [#allocation4 + $0x1], 0  ;;  %s1364_s18 = smov 0   ;;  %s1366_s19 = smov 0  }
   0xc   :  { %s1368_s20 = smov 0   ;;  %s1370_s21 = smov 0  }
   0xd   :  { %s1372_s22 = smov 0   ;;  %s1374_s23 = smov 0  }
   0xe   :  { %s1376_s24 = smov 0   ;;  %s1378_s25 = smov 0  }
   0xf   :  { %s1380_s26 = smov 0   ;;  %s1382_s27 = smov 0  }
  0x10   :  { %s1384_s28 = smov 0   ;;  %s1386_s29 = smov 0  }
  0x11   :  { %s1388_s30 = smov 0   ;;  %s1390_s6 = smov 0  }
  0x12 LB: > { %1912 = sst [smem:[#allocation17_spill]] %s1270_s18  ;;  %s1880_s7 = sadd.s32 1, %s1314_s29  ;;  %s1322_s6 = sphi %s1390_s6, %s27_s6   ;;  %s1318_s30 = sphi %s1388_s30, %s1984_s30   ;;  %s1314_s29 = sphi %s1386_s29, %s1992_s29   ;;  %s1310_s28 = sphi %s1384_s28, %s1982_s28   ;;  %s1306_s27 = sphi %s1382_s27, %s1991_s27   ;;  %s1302_s26 = sphi %s1380_s26, %s1990_s26   ;;  %s1298_s25 = sphi %s1378_s25, %s1989_s25   ;;  %s1294_s24 = sphi %s1376_s24, %s1988_s24   ;;  %s1290_s23 = sphi %s1374_s23, %s1987_s23   ;;  %s1286_s22 = sphi %s1372_s22, %s1986_s22   ;;  %s1282_s21 = sphi %s1370_s21, %s1980_s21   ;;  %s1278_s20 = sphi %s1368_s20, %s1979_s20   ;;  %s1274_s19 = sphi %s1366_s19, %s1985_s19   ;;  %s1270_s18 = sphi %s1364_s18, %s1977_s18  }
  0x13   : > { %1913 = sst [smem:[#allocation18_spill]] %s1274_s19  ;;  %p1438_p0 = scmp.ge.s32.totalorder %s1880_s7, 2 }
  0x14   : > { %1914 = sst [smem:[#allocation19_spill]] %s1278_s20  ;;  %p1883_p1 = scmp.eq.s32.totalorder %s1322_s6, 0 }
  0x15   : > { %1915 = sst [smem:[#allocation20_spill]] %s1286_s22  ;;  %p81_p2 = scmp.ne.s32.totalorder %s1290_s23, %s1286_s22 }
  0x16   : > { %1916 = sst [smem:[#allocation21_spill]] %s1306_s27  ;;  %p1882_p5 = scmp.lt.s32.totalorder %s1322_s6, 4 }
  0x17   : > { %1917 = sst [smem:[#allocation22_spill]] %s1310_s28  ;;  %p83_p4 = por %p81_p2, %p1883_p1 }
  0x18   : > { %1918 = sst [smem:[#allocation23_spill]] %s1318_s30  ;;  %s236_s12 = sand.u32 1, %s1290_s23  }
  0x19   : > { %s1919_s9 = scalar_select %p1438_p0, 1, 0 }
  0x1a   : > { %s788_s13 = sshll.u32 %s236_s12, 7  ;;  %s825_s14 = sshll.u32 %s1314_s29, 6 }
  0x1b   : > { %s244_s15 = sadd.s32 %s1318_s30, %s825_s14  ;;  %s238_s16 = scalar_lea.vmem [#allocation5], %s788_s13 }
  0x1c   : > { %s247_s17 = sshll.u32 %s238_s16, 4  ;;  %s791_s7 = sshll.u32 %s244_s15, 6  ;;  %s1455_s17 = int_to_ptr.vmem [resolvable:$true] %s247_s17 }
  0x1d   : > { %s1920_s1 = sld [smem:[#allocation33_spill]]  ;;  %p1464_p6 = pnand %p1882_p5, %p83_p4 }
  0x1e   : > { %s1922_s12 = sand.u32 1, %s1322_s6  }
  0x1f   : > { %s1470_s13 = scalar_lea.sflag [#allocation6], %s1922_s12  ;;  %p1016_p8 = pneg %p1464_p6 }
  0x23   : > { %s1460_s10 = scalar_lea.hbm %s1920_s1, %s791_s7  ;;  %s1019_s8 = scalar_lea.hbm %s1920_s1, 8192 }
  0x24   : > { %s1014_s14 = scalar_lea.hbm %s1460_s10, 2048  ;;  %p1020_p11 = scmp.lt.u32.totalorder %s1460_s10, %s1920_s1 }
  0x25   : > { %p1015_p7 = scmp.ne.s32.totalorder %s1460_s10, %s1014_s14  ;;  %p1021_p12 = scmp.lt.u32.totalorder %s1019_s8, %s1014_s14 }
  0x26   : > { %p1023_p2 = scmp.lt.u32.totalorder %s1014_s14, %s1460_s10 }
  0x27   : > { %p1017_p9 = pnand %p1016_p8, %p1015_p7  ;;  %p1022_p13 = por %p1021_p12, %p1020_p11 }
  0x29   : > { %p1018_p10 = pneg %p1017_p9  ;;  %p1024_p4 = por %p1023_p2, %p1022_p13 }
  0x2b   : > { %p1025_p5 = pnand %p1024_p4, %p1018_p10 }
  0x2d   : > { %1028 = shalt.err (!%p1025_p5)
}
  0x2e   : > { %s1029_s12 = scalar_lea.vmem %s1455_s17, 2048  ;;  %s1324_s5 = smov [#allocation5]  }
  0x2f   : > { %p1030_p7 = scmp.ne.s32.totalorder %s1455_s17, %s1029_s12  ;;  %s1034_s7 = sshll.u32 %s1324_s5, 4  ;;  %s1035_s7 = int_to_ptr.vmem [resolvable:$false] %s1034_s7 }
  0x30   : > { %s1036_s15 = scalar_lea.vmem %s1035_s7, 4096  ;;  %p1037_p3 = scmp.lt.s32.totalorder %s1455_s17, %s1035_s7 }
  0x31   : > { %p1032_p9 = pnand %p1030_p7, %p1016_p8  ;;  %p1038_p11 = scmp.lt.s32.totalorder %s1036_s15, %s1029_s12 }
  0x33   : > { %p1033_p1 = pneg %p1032_p9  ;;  %p1039_p12 = por %p1038_p11, %p1037_p3 }
  0x35   : > { %p1040_p13 = pnand %p1039_p12, %p1033_p1 }
  0x37   : > { %1043 = shalt.err (!%p1040_p13)
}
  0x38   : > { %s1325_s14 = smov 128   ;;  %s1326_s8 = smov 64  }
  0x39   : > { %s1327_s16 = smov 4   ;;  %p795_p1 = scmp.ge.s32.totalorder %s1322_s6, 1 }
  0x3a   : > { %866 = dma.hbm_to_vmem [thread:$0]  (!%p1464_p6), %s1460_s10, 2048, %s1455_s17, %s1470_s13, %s1325_s14, %s1326_s8, %s1327_s16  }
  0x3b   : > { %p306_p3 = scmp.lt.s32.totalorder %s1322_s6, 5  ;;  %s1505_s5 = sadd.s32 4294967295, %s1322_s6  }
  0x3c   : > { %1924 = sst [smem:[#allocation24_spill]] %s1505_s5  ;;  %s782_s7 = sadd.s32 4294967294, %s1322_s6  }
  0x3d   : > { %p1500_p5 = pnand %p795_p1, %p306_p3  ;;  %p1885_p8 = scmp.eq.s32.totalorder %s1505_s5, 0 }
  0x3e   : > { %s1925_s15 = sadd.s32 1, %s1318_s30  ;;  %p1926_p6 = scmp.ne.s32.totalorder %s1286_s22, %s1282_s21 }
  0x3f   : > { %s1923_s12 = scalar_select %p1500_p5, 1, 0 }
  0x40   : > { %s1994_s15 = smov (!%p1438_p0, %s1925_s15), %s1318_s30  ;;  %p1519_p10 = por %p1926_p6, %p1885_p8 }
  0x41   : > { %s100_s11 = sadd.s32 1, %s1278_s20  ;;  %p41_p2 = scmp.ge.s32.totalorder %s1994_s15, 2 }
  0x42   : > { %s1927_s10 = scalar_select %p1519_p10, 1, 0 }
  0x43   : > { %p107_p4 = scmp.ne.s32.totalorder %s1278_s20, %s1274_s19  ;;  %p113_p7 = scmp.ne.s32.totalorder %s1274_s19, %s1270_s18 }
  0x44   : > { %1928 = sst [smem:[#allocation25_spill]] %s1927_s10  ;;  %p189_p9 = scmp.eq.s32.totalorder %s1505_s5, 3 }
  0x45   : > { %s1996_s15 = smov (%p41_p2, %s1994_s15), 0  ;;  %p1930_p11 = scmp.eq.s32.totalorder %s1322_s6, 0 }
  0x46   : > { %1929 = sst [smem:[#allocation26_spill]] %s1996_s15  ;;  %p1535_p13 = por %p113_p7, %p1885_p8 }
  0x47   : > { %p109_p12 = por %p107_p4, %p1930_p11  ;;  %s1541_s17 = ssub.s32 %s1318_s30, %s1996_s15 }
  0x48   : > { %s1931_s21 = scalar_select %p1535_p13, 1, 0 }
  0x49   : > { %p1543_p1 = por %p189_p9, %p107_p4  ;;  %p98_p3 = scmp.eq.s32.totalorder %s1541_s17, 0 }
  0x4a   : > { %1932 = sst [smem:[#allocation27_spill]] %s1931_s21  ;;  %p195_p6 = scmp.eq.s32.totalorder %s782_s7, 3 }
  0x4b   : > { %s1933_s14 = scalar_select %p1543_p1, 1, 0 }
  0x4c   : > { %s1549_s8 = sand.u32 1, %s1278_s20   ;;  %s1552_s16 = sshll.u32 %s1318_s30, 4 }
  0x4d   : > { %1934 = sst [smem:[#allocation28_spill]] %s1933_s14  ;;  %p1557_p2 = por %p195_p6, %p113_p7 }
  0x4e   : > { %s1555_s1 = scalar_select %p98_p3, %s1278_s20, %s100_s11  }
  0x4f   : > { %s1936_s18 = scalar_select %p1557_p2, 1, 0 }
  0x50   : > { %1935 = sst [smem:[#allocation29_spill]] %s1555_s1  ;;  %p1938_p11 = scmp.lt.s32.totalorder %s1322_s6, 4 }
  0x51   : > { %1937 = sst [smem:[#allocation30_spill]] %s1936_s18  ;;  %s277_s11 = scalar_lea.vmem [#allocation8], %s1549_s8 }
  0x52   : > { %p1563_p8 = pnand %p1938_p11, %p109_p12  ;;  %s1940_s3 = sld [smem:[#allocation34_spill]] }
  0x53   : > { %s284_s30 = sshll.u32 %s277_s11, 4  ;;  %s1941_s1 = sand.u32 1, %s1322_s6   ;;  %s1574_s30 = int_to_ptr.vmem [resolvable:$true] %s284_s30 }
  0x54   : > { %s1939_s15 = scalar_select %p1563_p8, 1, 0 }
  0x55   : > { %s1578_s20 = scalar_lea.sflag [#allocation9], %s1941_s1  ;;  %p1584_p7 = pneg %p1563_p8 }
  0x58   : > { %s1571_s7 = scalar_lea.hbm %s1940_s3, %s1552_s16  ;;  %s1049_s11 = scalar_lea.hbm %s1940_s3, 32 }
  0x59   : > { %s1044_s18 = scalar_lea.hbm %s1571_s7, 16  ;;  %p1050_p3 = scmp.lt.u32.totalorder %s1571_s7, %s1940_s3 }
  0x5a   : > { %p1045_p4 = scmp.ne.s32.totalorder %s1571_s7, %s1044_s18  ;;  %p1051_p6 = scmp.lt.u32.totalorder %s1049_s11, %s1044_s18 }
  0x5b   : > { %p1053_p2 = scmp.lt.u32.totalorder %s1044_s18, %s1571_s7 }
  0x5c   : > { %p1047_p9 = pnand %p1584_p7, %p1045_p4  ;;  %p1052_p11 = por %p1051_p6, %p1050_p3 }
  0x5e   : > { %p1048_p12 = pneg %p1047_p9  ;;  %p1054_p1 = por %p1053_p2, %p1052_p11 }
  0x60   : > { %p1055_p13 = pnand %p1054_p1, %p1048_p12 }
  0x62   : > { %1058 = shalt.err (!%p1055_p13)
}
  0x63   : > { %s1059_s1 = scalar_lea.vmem %s1574_s30, 16  ;;  %s1328_s28 = smov [#allocation8]  }
  0x64   : > { %p1060_p4 = scmp.ne.s32.totalorder %s1574_s30, %s1059_s1  ;;  %s1064_s14 = sshll.u32 %s1328_s28, 4  ;;  %s1065_s14 = int_to_ptr.vmem [resolvable:$false] %s1064_s14 }
  0x65   : > { %s1066_s19 = scalar_lea.vmem %s1065_s14, 32  ;;  %p1067_p5 = scmp.lt.s32.totalorder %s1574_s30, %s1065_s14 }
  0x66   : > { %p1062_p9 = pnand %p1060_p4, %p1584_p7  ;;  %p1068_p0 = scmp.lt.s32.totalorder %s1066_s19, %s1059_s1 }
  0x68   : > { %p1063_p10 = pneg %p1062_p9  ;;  %p1069_p3 = por %p1068_p0, %p1067_p5 }
  0x6a   : > { %p1070_p6 = pnand %p1069_p3, %p1063_p10 }
  0x6c   : > { %1073 = shalt.err (!%p1070_p6)
}
  0x6d   : > { %872 = dma.hbm_to_vmem [thread:$0]  (!%p1563_p8), %s1571_s7, 16, %s1574_s30, %s1578_s20  }
  0x6e   : > { %s1943_s18 = sadd.s32 1, %s1314_s29  ;;  %p1944_p0 = scmp.ne.s32.totalorder %s1919_s9, 0 }
  0x6f   : > { %s46_s21 = sadd.s32 1, %s1302_s26  ;;  %p53_p5 = scmp.ne.s32.totalorder %s1302_s26, %s1298_s25 }
  0x70   : > { %s1998_s18 = smov (%p1944_p0, %s1943_s18), 0  ;;  %p59_p10 = scmp.ne.s32.totalorder %s1298_s25, %s1294_s24 }
  0x71   : > { %1945 = sst [smem:[#allocation31_spill]] %s1998_s18  ;;  %s43_s11 = ssub.s32 %s1314_s29, %s1998_s18 }
  0x72   : > { %p44_p13 = scmp.eq.s32.totalorder %s43_s11, 0  ;;  %p1946_p1 = scmp.eq.s32.totalorder %s1322_s6, 0 }
  0x73   : > { %p1948_p12 = scmp.eq.s32.totalorder %s1505_s5, 0  ;;  %s71_s9 = sor.u32 %s1541_s17, %s43_s11 }
  0x74   : > { %p1623_p2 = por %p1946_p1, %p53_p5  ;;  %p72_p4 = scmp.eq.s32.totalorder %s71_s9, 0 }
  0x75   : > { %p1629_p11 = por %p1948_p12, %p59_p10  ;;  %s215_s28 = sand.u32 1, %s1302_s26  }
  0x76   : > { %s1635_s7 = scalar_select %p44_p13, %s1302_s26, %s46_s21  }
  0x77   : > { %s1949_s30 = scalar_select %p1629_p11, 1, 0 }
  0x78   : > { %s785_s24 = sshll.u32 %s215_s28, 4  ;;  %s1951_s14 = sadd.s32 1, %s1290_s23 }
  0x79   : > { %1950 = sst [smem:[#allocation32_spill]] %s1949_s30  ;;  %s824_s3 = sshll.u32 %s1314_s29, 8 }
  0x7a   : > { %s1641_s19 = scalar_select %p72_p4, %s1290_s23, %s1951_s14  }
  0x7b   : > { %s1647_s22 = scalar_lea.hbm %s1874_s0, %s824_s3  ;;  %s219_s5 = scalar_lea.vmem [#allocation2], %s785_s24 }
  0x7c   : > { %s227_s30 = sshll.u32 %s219_s5, 4  ;;  %p1952_p9 = scmp.lt.s32.totalorder %s1322_s6, 4  ;;  %s1649_s30 = int_to_ptr.vmem [resolvable:$true] %s227_s30 }
  0x7d   : > { %s1663_s3 = scalar_lea.hbm %s1876_s2, %s1552_s16  ;;  %s260_s10 = scalar_lea.vmem [#allocation7], %s1549_s8 }
  0x7e   : > { %p1655_p3 = pnand %p1952_p9, %p1623_p2  ;;  %s1666_s18 = sshll.u32 %s260_s10, 4  ;;  %s268_s18 = int_to_ptr.vmem [resolvable:$true] %s1666_s18 }
  0x7f   : > { %s216_s5 = scalar_lea.sflag [#allocation3], %s215_s28  ;;  %s1074_s9 = scalar_lea.hbm %s1647_s22, 256 }
  0x80   : > { %p1075_p6 = scmp.ne.s32.totalorder %s1647_s22, %s1074_s9  ;;  %p1076_p0 = pneg %p1655_p3 }
  0x81   : > { %s1079_s14 = scalar_lea.hbm %s1874_s0, 512  ;;  %p1080_p13 = scmp.lt.u32.totalorder %s1647_s22, %s1874_s0 }
  0x82   : > { %p1077_p5 = pnand %p1076_p0, %p1075_p6  ;;  %p1081_p1 = scmp.lt.u32.totalorder %s1079_s14, %s1074_s9 }
  0x83   : > { %p1083_p12 = scmp.lt.u32.totalorder %s1074_s9, %s1647_s22 }
  0x84   : > { %p1078_p10 = pneg %p1077_p5  ;;  %p1082_p2 = por %p1081_p1, %p1080_p13 }
  0x86   : > { %p1084_p4 = por %p1083_p12, %p1082_p2 }
  0x88   : > { %p1085_p9 = pnand %p1084_p4, %p1078_p10 }
  0x8a   : > { %1088 = shalt.err (!%p1085_p9)
}
  0x8b   : > { %s1089_s28 = scalar_lea.vmem %s1649_s30, 256  ;;  %s1329_s10 = smov [#allocation2]  }
  0x8c   : > { %p1090_p6 = scmp.ne.s32.totalorder %s1649_s30, %s1089_s28  ;;  %s1094_s1 = sshll.u32 %s1329_s10, 4  ;;  %s1095_s1 = int_to_ptr.vmem [resolvable:$false] %s1094_s1 }
  0x8d   : > { %s1096_s24 = scalar_lea.vmem %s1095_s1, 512  ;;  %p1097_p8 = scmp.lt.s32.totalorder %s1649_s30, %s1095_s1 }
  0x8e   : > { %p1092_p5 = pnand %p1090_p6, %p1076_p0  ;;  %p1098_p13 = scmp.lt.s32.totalorder %s1096_s24, %s1089_s28 }
  0x90   : > { %p1093_p11 = pneg %p1092_p5  ;;  %p1099_p1 = por %p1098_p13, %p1097_p8 }
  0x92   : > { %p1100_p2 = pnand %p1099_p1, %p1093_p11 }
  0x94   : > { %1103 = shalt.err (!%p1100_p2)
}
  0x95   : > { %863 = dma.hbm_to_vmem [thread:$0]  (!%p1655_p3), %s1647_s22, 256, %s1649_s30, %s216_s5  }
  0x96   : > { %s1104_s9 = scalar_lea.hbm %s1663_s3, 16  ;;  %s1109_s11 = scalar_lea.hbm %s1876_s2, 32 }
  0x97   : > { %p1105_p0 = scmp.ne.s32.totalorder %s1663_s3, %s1104_s9  ;;  %p1110_p8 = scmp.lt.u32.totalorder %s1663_s3, %s1876_s2 }
  0x98   : > { %p1111_p11 = scmp.lt.u32.totalorder %s1109_s11, %s1104_s9  ;;  %p1113_p9 = scmp.lt.u32.totalorder %s1104_s9, %s1663_s3 }
  0x99   : > { %p1107_p10 = pnand %p1105_p0, %p1584_p7 }
  0x9a   : > { %p1112_p4 = por %p1111_p11, %p1110_p8 }
  0x9b   : > { %p1108_p12 = pneg %p1107_p10 }
  0x9c   : > { %p1114_p6 = por %p1113_p9, %p1112_p4 }
  0x9e   : > { %p1115_p5 = pnand %p1114_p6, %p1108_p12 }
  0xa0   : > { %1118 = shalt.err (!%p1115_p5)
}
  0xa1   : > { %s1119_s22 = scalar_lea.vmem %s268_s18, 16  ;;  %s1330_s30 = smov [#allocation7]  }
  0xa2   : > { %p1120_p3 = scmp.ne.s32.totalorder %s268_s18, %s1119_s22  ;;  %s1124_s5 = sshll.u32 %s1330_s30, 4  ;;  %s1125_s5 = int_to_ptr.vmem [resolvable:$false] %s1124_s5 }
  0xa3   : > { %s1126_s10 = scalar_lea.vmem %s1125_s5, 32  ;;  %p1127_p2 = scmp.lt.s32.totalorder %s268_s18, %s1125_s5 }
  0xa4   : > { %p1122_p13 = pnand %p1120_p3, %p1584_p7  ;;  %p1128_p0 = scmp.lt.s32.totalorder %s1126_s10, %s1119_s22 }
  0xa6   : > { %p1123_p1 = pneg %p1122_p13  ;;  %p1129_p10 = por %p1128_p0, %p1127_p2 }
  0xa8   : > { %p1130_p8 = pnand %p1129_p10, %p1123_p1 }
  0xaa   : > { %1133 = shalt.err (!%p1130_p8)
}
  0xab   : > { %p1954_p11 = scmp.ne.s32.totalorder %s1939_s15, 0  ;;  %s1716_s9 = scalar_lea.hbm %s1878_s4, %s1552_s16 }
  0xac   : > { %s294_s14 = scalar_lea.vmem [#allocation10], %s1549_s8  ;;  %s1134_s11 = scalar_lea.hbm %s1716_s9, 16 }
  0xad   : > { %869 = dma.hbm_to_vmem [thread:$0]  (!%p1954_p11), %s1663_s3, 16, %s268_s18, %s1470_s13  }
  0xae   : > { %s301_s21 = sshll.u32 %s294_s14, 4  ;;  %p1135_p12 = scmp.ne.s32.totalorder %s1716_s9, %s1134_s11  ;;  %s302_s21 = int_to_ptr.vmem [resolvable:$true] %s301_s21 }
  0xaf   : > { %s1139_s13 = scalar_lea.hbm %s1878_s4, 32  ;;  %p1140_p6 = scmp.lt.u32.totalorder %s1716_s9, %s1878_s4 }
  0xb0   : > { %p1137_p4 = pnand %p1135_p12, %p1584_p7  ;;  %p1141_p5 = scmp.lt.u32.totalorder %s1139_s13, %s1134_s11 }
  0xb1   : > { %p1143_p13 = scmp.lt.u32.totalorder %s1134_s11, %s1716_s9 }
  0xb2   : > { %p1138_p9 = pneg %p1137_p4  ;;  %p1142_p3 = por %p1141_p5, %p1140_p6 }
  0xb4   : > { %p1144_p1 = por %p1143_p13, %p1142_p3 }
  0xb6   : > { %p1145_p2 = pnand %p1144_p1, %p1138_p9 }
  0xb8   : > { %1148 = shalt.err (!%p1145_p2)
}
  0xb9   : > { %s1149_s8 = scalar_lea.vmem %s302_s21, 16  ;;  %s1331_s16 = smov [#allocation10]  }
  0xba   : > { %p1150_p0 = scmp.ne.s32.totalorder %s302_s21, %s1149_s8  ;;  %s1154_s22 = sshll.u32 %s1331_s16, 4  ;;  %s1155_s22 = int_to_ptr.vmem [resolvable:$false] %s1154_s22 }
  0xbb   : > { %s1156_s30 = scalar_lea.vmem %s1155_s22, 32  ;;  %p1157_p12 = scmp.lt.s32.totalorder %s302_s21, %s1155_s22 }
  0xbc   : > { %p1152_p10 = pnand %p1150_p0, %p1584_p7  ;;  %p1158_p4 = scmp.lt.s32.totalorder %s1156_s30, %s1149_s8 }
  0xbe   : > { %p1153_p8 = pneg %p1152_p10  ;;  %p1159_p11 = por %p1158_p4, %p1157_p12 }
  0xc0   : > { %p1160_p5 = pnand %p1159_p11, %p1153_p8 }
  0xc2   : > { %1163 = shalt.err (!%p1160_p5)
}
  0xc3   : > { %p1955_p6 = scmp.ne.s32.totalorder %s1939_s15, 0  ;;  %p1956_p9 = scmp.ne.s32.totalorder %s1923_s12, 0 }
  0xc4   : > { %s1957_s27 = sld [smem:[#allocation32_spill]] (!%p1956_p9)  ;;  %s312_s5 = sand.u32 (!%p1956_p9), 1, %s1298_s25  }
  0xc5   : > { %875 = dma.hbm_to_vmem [thread:$0]  (!%p1955_p6), %s1716_s9, 16, %s302_s21, %s1578_s20  }
  0xc6   : > { %310 = sbr.rel (%p1956_p9) target bundleno = 523 (0x20b), region = 40  ;;  %s1740_s10 = sshll.u32 (!%p1956_p9), %s312_s5, 4 }
  0xc7   : > { %s313_s1 = scalar_lea.sflag (!%p1956_p9), [#allocation3], %s312_s5  ;;  %s316_s24 = scalar_lea.vmem (!%p1956_p9), [#allocation2], %s1740_s10 }
  0xca   : > { %p1958_p7 = scmp.ne.s32.totalorder (!%p1956_p9), %s1957_s27, 0 }
  0xcd   : > { %1249 = dma.done.wait (%p1958_p7), %s313_s1, 256  }
  0xce   : > { %1251 = vsyncadd (%p1958_p7), %s313_s1, 4294967040  ;;  %s1959_s15 = sld [smem:[#allocation24_spill]]  ;;  %s1961_s11 = sld [smem:[#allocation25_spill]] }
  0xcf   : > { %s1960_s14 = sld [smem:[#allocation20_spill]] }
  0xd4   : > { %s321_s20 = sand.u32 1, %s1959_s15   ;;  %p1962_p11 = scmp.ne.s32.totalorder %s1961_s11, 0 }
  0xd5   : > { %s323_s9 = sand.u32 1, %s1960_s14   ;;  %s322_s21 = scalar_lea.sflag [#allocation6], %s321_s20 }
  0xd6   : > { %s797_s12 = sshll.u32 %s323_s9, 7 }
  0xd7   : > { %s1749_s17 = scalar_lea.vmem [#allocation5], %s797_s12 }
  0xd8   : > { %1253 = dma.done.wait (%p1962_p11), %s322_s21, 2048  }
  0xd9   : > { %1255 = vsyncadd (%p1962_p11), %s322_s21, 4294965248  ;;  %s1963_s28 = sld [smem:[#allocation18_spill]]  ;;  %s1964_s13 = sld [smem:[#allocation27_spill]] }
  0xdf   : > { %s1756_s3 = sand.u32 1, %s1963_s28   ;;  %p1965_p3 = scmp.ne.s32.totalorder %s1964_s13, 0 }
  0xe0   : > { %s333_s18 = scalar_lea.vmem [#allocation7], %s1756_s3 }
  0xe1   : > { %1257 = dma.done.wait (%p1965_p3), %s322_s21, 16  }
  0xe2   : > { %1259 = vsyncadd (%p1965_p3), %s322_s21, 4294967280  ;;  %s339_s8 = scalar_lea.sflag [#allocation9], %s321_s20  ;;  %s341_s16 = scalar_lea.vmem [#allocation8], %s1756_s3 }
  0xe3   : > { %1261 = dma.done.wait (%p1965_p3), %s339_s8, 32  }
  0xe4   : > { %1263 = vsyncadd (%p1965_p3), %s339_s8, 4294967264  ;;  %s798_s22 = sshll.u32 %s1756_s3, 3  ;;  %v998_v0 = vld [vmem:[%s1749_s17 + $0x40] sm:$0xff]   ;;  %v1000_v2 = vld [vmem:[%s1749_s17 + $0x48] sm:$0xff]   ;;  %s349_s30 = scalar_lea.vmem [#allocation10], %s1756_s3 }
  0xe5   : > { %v999_v1 = vld [vmem:[%s1749_s17] sm:$0xff]   ;;  %826 = vmatprep.subr.bf16.mxu0 %v998_v0  ;;  %v1001_v3 = vld [vmem:[%s1749_s17 + $0x8] sm:$0xff]   ;;  %v1002_v4 = vld [vmem:[%s1749_s17 + $0x50] sm:$0xff]   ;;  %s392_s27 = scalar_lea.vmem [#allocation11], %s798_s22  ;;  %s1966_s5 = sld [smem:[#allocation21_spill]] }
  0xe6   : > { %827 = vmatpush3.bf16.msra.mxu0 %v999_v1  ;;  %v1003_v5 = vld [vmem:[%s1749_s17 + $0x10] sm:$0xff]   ;;  %v1004_v6 = vld [vmem:[%s1749_s17 + $0x58] sm:$0xff]   ;;  %v1006_v8 = vld [vmem:[%s1749_s17 + $0x60] sm:$0xff]  }
  0xe7   : > { %828 = vmatprep.subr.bf16.mxu0 %v1000_v2  ;;  %v1005_v7 = vld [vmem:[%s1749_s17 + $0x18] sm:$0xff]   ;;  %v1007_v9 = vld [vmem:[%s1749_s17 + $0x20] sm:$0xff]   ;;  %v1008_v10 = vld [vmem:[%s1749_s17 + $0x68] sm:$0xff]  }
  0xe8   : > { %v397_v11 = vld [vmem:[%s316_s24 + $0x8] sm:$0xff]  ;;  %v1010_v14 = vld [vmem:[%s1749_s17 + $0x70] sm:$0xff]  }
  0xe9   : > { %v399_v12 = vpack.c.bf16 %v397_v11, %v397_v11  ;;  %v1009_v13 = vld [vmem:[%s1749_s17 + $0x28] sm:$0xff]   ;;  %v1011_v15 = vld [vmem:[%s1749_s17 + $0x30] sm:$0xff]   ;;  %v1012_v16 = vld [vmem:[%s1749_s17 + $0x78] sm:$0xff]  }
  0xea   : > { %829 = vmatpush3.bf16.msra.mxu0 %v1001_v3  ;;  %v1013_v17 = vld [vmem:[%s1749_s17 + $0x38] sm:$0xff]   ;;  %v396_v18 = vld [vmem:[%s316_s24] sm:$0xff] }
  0xeb   : > { %830 = vmatprep.subr.bf16.mxu0 %v1002_v4  ;;  %560 = vmatprep.mubr.bf16.mxu0 %v399_v12  ;;  %v398_v19 = vpack.c.bf16 %v396_v18, %v396_v18  ;;  %p815_p13 = scmp.ne.s32.totalorder %s1966_s5, 0 }
  0xec   : > { %v1332_v25 = vmov (!%p815_p13), 0.0  }
  0xed   : > { %572 = vst [vmem:[%s392_s27] sm:$0xff] (!%p815_p13), %v1332_v25 }
  0xee   : > { %831 = vmatpush3.bf16.msra.mxu0 %v1003_v5 }
  0xef   : > { %832 = vmatprep.subr.bf16.mxu0 %v1004_v6 }
  0xf2   : > { %833 = vmatpush3.bf16.msra.mxu0 %v1005_v7 }
  0xf3   : > { %834 = vmatprep.subr.bf16.mxu0 %v1006_v8 }
  0xf6   : > { %835 = vmatpush3.bf16.msra.mxu0 %v1007_v9 }
  0xf7   : > { %836 = vmatprep.subr.bf16.mxu0 %v1008_v10 }
  0xfa   : > { %837 = vmatpush3.bf16.msra.mxu0 %v1009_v13 }
  0xfb   : > { %838 = vmatprep.subr.bf16.mxu0 %v1010_v14 }
  0xfe   : > { %839 = vmatpush3.bf16.msra.mxu0 %v1011_v15 }
  0xff   : > { %840 = vmatprep.subr.bf16.mxu0 %v1012_v16 }
 0x102   : > { %841 = vmatpush3.bf16.msra.mxu0 %v1013_v17 }
 0x105   : > { %561 = vmatmul.mubr.bf16.vlgmr.msra.gmra.mrb[0].mxu0 %v398_v19 }
 0x1d5   : > { %571 = sbr.rel (%p815_p13) target bundleno = 476 (0x1dc), region = 64 }
 0x1d8   : > { %v842_v20 = vpop.f32.mrb[0].mxu0 }
 0x1d9   : > { %v843_v21 = vpop.f32.mrb[1].mxu0 }
 0x1da   : > { %v844_v22 = vadd.f32 %v843_v21, %v842_v20  ;;  %v845_v23 = vpop.f32.mrb[2].mxu0 }
 0x1db   : > { %v846_v24 = vpop.f32.mrb[3].mxu0 }
 0x1dc PF: > { %v573_v26 = vld [vmem:[%s392_s27] sm:$0xff]  ;;  %s1967_s10 = sld [smem:[#allocation21_spill]] }
 0x1dd   : > { %v574_v27 = vadd.f32 %v844_v22, %v573_v26 }
 0x1df   : > { %575 = vst [vmem:[%s392_s27] sm:$0xff] %v574_v27 }
 0x1e2   : > { %p816_p1 = scmp.ne.s32.totalorder %s1967_s10, 1 }
 0x1e3   : > { %v817_v29 = vld [vmem:[%s333_s18] ss:$0 sm:$0xff] (!%p816_p1) }
 0x1e4   : > { %579 = sbr.rel (%p816_p1) target bundleno = 496 (0x1f0), region = 68  ;;  %v818_v31 = vld [vmem:[%s341_s16] ss:$0 sm:$0xff] (!%p816_p1) }
 0x1e5   : > { %v819_v33 = vld [vmem:[%s349_s30] ss:$0 sm:$0xff] (!%p816_p1) }
 0x1e6   : > { %v580_v28 = vld [vmem:[%s392_s27] sm:$0xff] (!%p816_p1) }
 0x1e7   : > { %v588_v30 = vadd.f32 (!%p816_p1), %v817_v29, %v580_v28 }
 0x1e9   : > { %v589_v32 = vmax.f32 (!%p816_p1), %v588_v30, 0.0 }
 0x1eb   : > { %v597_v34 = vmul.f32 %v818_v31, %v589_v32 }
 0x1ed   : > { %v605_v35 = vadd.f32 %v819_v33, %v597_v34 }
 0x1ef   : > { %606 = vst [vmem:[%s392_s27] sm:$0xff] %v605_v35 }
 0x1f0 PF: > { %s1968_s1 = sld [smem:[#allocation22_spill]]  ;;  %s1969_s24 = sld [smem:[#allocation28_spill]] }
 0x1f1   : > { %s1970_s20 = sld [smem:[#allocation35_spill]]  ;;  %s621_s21 = sshll.u32 %s392_s27, 4  ;;  %s622_s21 = int_to_ptr.vmem [resolvable:$true] %s621_s21 }
 0x1f2   : > { %s608_s17 = scalar_lea.sflag [#allocation4], %s1756_s3  ;;  %s1164_s28 = scalar_lea.vmem %s622_s21, 128 }
 0x1f3   : > { %p1165_p2 = scmp.ne.s32.totalorder %s622_s21, %s1164_s28  ;;  %s1333_s13 = smov [#allocation11]  }
 0x1f4   : > { %s1168_s18 = sshll.u32 %s1333_s13, 4  ;;  %s1169_s18 = int_to_ptr.vmem [resolvable:$false] %s1168_s18 }
 0x1f5   : > { %s1170_s8 = scalar_lea.vmem %s1169_s18, 256  ;;  %p1171_p12 = scmp.lt.s32.totalorder %s622_s21, %s1169_s18 }
 0x1f6   : > { %s821_s15 = sshll.u32 %s1968_s1, 7  ;;  %p1972_p0 = scmp.ne.s32.totalorder %s1969_s24, 0 }
 0x1f7   : > { %s1971_s9 = smov %s1970_s20  ;;  %s1802_s12 = scalar_lea.hbm %s1970_s20, %s821_s15 }
 0x1f8   : > { %p1166_p10 = pnand %p1165_p2, %p1972_p0  ;;  %p1172_p4 = scmp.lt.s32.totalorder %s1170_s8, %s1164_s28 }
 0x1fa   : > { %p1167_p8 = pneg %p1166_p10  ;;  %p1173_p5 = por %p1172_p4, %p1171_p12 }
 0x1fc   : > { %p1174_p6 = pnand %p1173_p5, %p1167_p8 }
 0x1fe   : > { %1177 = shalt.err (!%p1174_p6)
}
 0x1ff   : > { %s1178_s3 = scalar_lea.hbm %s1802_s12, 128  ;;  %s1182_s30 = scalar_lea.hbm %s1971_s9, 256 }
 0x200   : > { %p1179_p9 = scmp.ne.s32.totalorder %s1802_s12, %s1178_s3  ;;  %p1183_p3 = scmp.lt.u32.totalorder %s1802_s12, %s1971_s9 }
 0x201   : > { %p1184_p13 = scmp.lt.u32.totalorder %s1182_s30, %s1178_s3  ;;  %p1186_p2 = scmp.lt.u32.totalorder %s1178_s3, %s1802_s12 }
 0x202   : > { %p1180_p7 = pnand %p1179_p9, %p1972_p0 }
 0x203   : > { %p1185_p1 = por %p1184_p13, %p1183_p3 }
 0x204   : > { %p1181_p11 = pneg %p1180_p7 }
 0x205   : > { %p1187_p10 = por %p1186_p2, %p1185_p1 }
 0x207   : > { %p1188_p8 = pnand %p1187_p10, %p1181_p11 }
 0x209   : > { %1191 = shalt.err (!%p1188_p8)
}
 0x20a   : > { %858 = dma.vmem_to_hbm [thread:$0]  (%p1972_p0), %s622_s21, 128, %s1802_s12, %s608_s17  }
 0x20b PF: > { %s1973_s10 = sld [smem:[#allocation17_spill]]  ;;  %s1974_s1 = sld [smem:[#allocation30_spill]] }
 0x20c   : > { %p881_p12 = scmp.ge.s32.totalorder %s1322_s6, 2 }
 0x211   : > { %s633_s15 = sand.u32 1, %s1973_s10   ;;  %p1975_p4 = scmp.ne.s32.totalorder %s1974_s1, 0 }
 0x212   : > { %s634_s14 = scalar_lea.sflag [#allocation4], %s633_s15 }
 0x213   : > { %p877_p5 = pnand %p881_p12, %p1975_p4 }
 0x215   : > { %1265 = dma.done.wait (!%p877_p5), %s634_s14, 128  }
 0x216   : > { %1267 = vsyncadd (!%p877_p5), %s634_s14, 4294967168  ;;  %s27_s6 = sadd.s32 1, %s1322_s6   ;;  %s1977_s18 = sld [smem:[#allocation18_spill]] }
 0x217   : > { %p1827_p6 = scmp.ge.s32.totalorder %s27_s6, 6   ;;  %s1978_s24 = sld [smem:[#allocation19_spill]] }
 0x218   : > { %s1979_s20 = sld [smem:[#allocation29_spill]]  ;;  %s1980_s21 = sld [smem:[#allocation20_spill]] }
 0x219   : > { %s1981_s12 = smov %s1641_s19  ;;  %s1982_s28 = sld [smem:[#allocation23_spill]] }
 0x21a   : > { %s1983_s17 = sld [smem:[#allocation31_spill]]  ;;  %s1984_s30 = sld [smem:[#allocation26_spill]] }
 0x21b   : > { %s1986_s22 = smov %s1290_s23  ;;  %s1987_s23 = smov %s1981_s12 }
 0x21c   : > { %s1991_s27 = smov %s1314_s29  ;;  %26 = sbr.rel (!%p1827_p6) target bundleno = 18 (0x12), region = 141 }
 0x21d   : > { %s1985_s19 = smov %s1978_s24  ;;  %s1988_s24 = smov %s1298_s25 }
 0x21e   : > { %s1989_s25 = smov %s1302_s26  ;;  %s1990_s26 = smov %s1635_s7 }
 0x220   : > { %s1992_s29 = smov %s1983_s17 }
 0x223   :  { %639 = vsyncpa [#allocation3], 1 }
 0x224   :  { %641 = vsyncpa [#allocation3 + $0x1], 1 }
 0x225   :  { %642 = vsyncpa [#allocation6], 1 }
 0x226   :  { %644 = vsyncpa [#allocation6 + $0x1], 1 }
 0x227   :  { %645 = vsyncpa [#allocation9], 1 }
 0x228   :  { %647 = vsyncpa [#allocation9 + $0x1], 1 }
 0x229   :  { %648 = vsyncpa [#allocation4], 1 }
 0x22a   :  { %650 = vsyncpa [#allocation4 + $0x1], 1 }

</bundles_post_ra>
